<compile_context>
chip_gen: v5e
topology: v5e:2x2
jax: 0.10.0
libtpu: 0.0.40
codegen_flags: <defaults>
</compile_context>

<pallas_src>
from functools import partial

import jax
import jax.numpy as jnp
from jax.experimental import pallas as pl
from jax.experimental.pallas import tpu as pltpu


def _round_up(x, m):
    return ((x + m - 1) // m) * m


def _decoder_input_kernel(ids_ref, mapper_ref, emb_hbm, summ_ref, out_ref,
                          emb_buf, sem, *, dim, tb, vocsize):
    t = pl.program_id(0)

    # Issue all TB embedding-row gathers back-to-back (all in flight at once),
    # then wait.  The ids/mapper lookups are scalar SMEM reads (free in the
    # bundle); the gather itself is TB small row DMAs HBM -> VMEM scratch.
    copies = []
    for r in range(tb):                                    # static unroll
        tok = ids_ref[t * tb + r]
        mid = mapper_ref[tok]
        mid = jnp.clip(mid, 0, vocsize - 1)                # guard OOB DMA
        cp = pltpu.make_async_copy(
            emb_hbm.at[pl.ds(mid, 1)],                     # (1, D) HBM row
            emb_buf.at[pl.ds(r, 1)],                       # (1, D) VMEM slot
            sem.at[r],
        )
        cp.start()
        copies.append(cp)
    for cp in copies:
        cp.wait()

    # Write the two slabs of the output block directly (no concat intermediate).
    # When D is a multiple of 128 both writes are lane-aligned unmasked stores.
    # TODO(synk): for production sizes pad D and D+E up to multiples of 128 so
    # the sub-128-lane case also lowers to unmasked vst.
    out_ref[:, :dim] = emb_buf[...].astype(out_ref.dtype)
    out_ref[:, dim:] = summ_ref[...].astype(out_ref.dtype)


def decoder_input_layer(ids, prev_inp_summ, mapper, emb_weight):
    """Pallas implementation of DecoderInputLayer.forward (prev_mem_summ unused)."""
    B = ids.shape[0]
    V, D = emb_weight.shape
    E = prev_inp_summ.shape[1]

    # torch.cat requires matching dtypes; use the promoted type to be safe.
    out_dtype = jnp.result_type(emb_weight.dtype, prev_inp_summ.dtype)

    # Rows per grid step: a multiple of the sublane pack for the output dtype,
    # capped so one step stays a small, VMEM-trivial tile.
    sub = 16 if jnp.dtype(out_dtype).itemsize == 2 else 8
    TB = min(_round_up(B, sub), 8 * sub)
    B_pad = _round_up(B, TB)

    # Pad the batch so the grid evenly divides; padded ids are 0 (a valid row),
    # padded output rows are sliced off below.
    ids_pad = jnp.zeros((B_pad,), jnp.int32).at[:B].set(ids.astype(jnp.int32))
    summ_pad = jnp.zeros((B_pad, E), prev_inp_summ.dtype).at[:B].set(prev_inp_summ)

    # TODO(synk): if V is too large for SMEM (roughly > ~128K int32 entries),
    # fall back to gathering mapper[ids] outside and prefetching only mapped ids.
    mapper_i32 = mapper.astype(jnp.int32)

    grid_spec = pltpu.PrefetchScalarGridSpec(
        num_scalar_prefetch=2,                # ids, mapper -> SMEM
        grid=(B_pad // TB,),
        in_specs=[
            pl.BlockSpec(memory_space=pl.ANY),                   # emb table, HBM
            pl.BlockSpec((TB, E), lambda t, ids, mp: (t, 0)),    # prev_inp_summ
        ],
        out_specs=pl.BlockSpec((TB, D + E), lambda t, ids, mp: (t, 0)),
        scratch_shapes=[
            pltpu.VMEM((TB, D), emb_weight.dtype),               # gathered rows
            pltpu.SemaphoreType.DMA((TB,)),
        ],
    )

    out = pl.pallas_call(
        partial(_decoder_input_kernel, dim=D, tb=TB, vocsize=V),
        out_shape=jax.ShapeDtypeStruct((B_pad, D + E), out_dtype),
        grid_spec=grid_spec,
        compiler_params=pltpu.CompilerParams(
            dimension_semantics=("parallel",),
        ),
    )(ids_pad, mapper_i32, emb_weight, summ_pad)

    return out[:B]


if __name__ == "__main__":
    # Module hyperparameters (small, consistent with the forward semantics)
    vocsize = 32
    dim = 32        # embedding dim
    encdim = 32     # dim of prev_inp_summ
    unkid = 1
    unktoks = {3, 5, 17}
    batch = 8

    key = jax.random.PRNGKey(0)
    k_emb, k_ids, k_summ = jax.random.split(key, 3)

    # Deterministic parameter init: torch.nn.Embedding default is N(0, 1)
    emb_weight = jax.random.normal(k_emb, (vocsize, dim), dtype=jnp.float32)

    # mapper buffer: identity except unk tokens -> unkid
    mapper = jnp.arange(vocsize, dtype=jnp.int32)
    for t in sorted(unktoks):
        mapper = mapper.at[t].set(unkid)

    # Example inputs
    ids = jax.random.randint(k_ids, (batch,), 0, vocsize, dtype=jnp.int32)
    prev_inp_summ = jax.random.normal(k_summ, (batch, encdim), dtype=jnp.float32)

    out = decoder_input_layer(ids, prev_inp_summ, mapper, emb_weight)
    out = jax.block_until_ready(out)

    # Reference (pure JAX) check of the forward semantics
    ref = jnp.concatenate([emb_weight[mapper[ids]], prev_inp_summ], axis=1)
    assert out.shape == (batch, dim + encdim)
    assert jnp.allclose(out, ref, atol=1e-5, rtol=1e-5)

    print("KERNEL_OK")
</pallas_src>

<mosaic_0001>
module attributes {stable_mosaic.version = 11 : i64} {
  func.func @_decoder_input_kernel(%arg0: i32, %arg1: memref<8xi32, #tpu.memory_space<smem>>, %arg2: memref<32xi32, #tpu.memory_space<smem>>, %arg3: memref<32x32xf32, #tpu.memory_space<any>>, %arg4: memref<8x32xf32, #tpu.memory_space<vmem>>, %arg5: memref<8x64xf32, #tpu.memory_space<vmem>>, %arg6: memref<8x32xf32, #tpu.memory_space<vmem>>, %arg7: memref<8x!tpu.dma_semaphore, #tpu.memory_space<semaphore_mem>>) attributes {dimension_semantics = [#tpu.dimension_semantics<parallel>], iteration_bounds = array<i64: 1>, scalar_prefetch = 2 : i64, scratch_operands = 2 : i64, tpu.core_type = #tpu.core_type<tc>, window_params = [{}, {transform_indices = @transform_1, window_bounds = array<i64: 8, 32>}, {transform_indices = @transform_2, window_bounds = array<i64: 8, 64>}]} {
    %c8_i32 = arith.constant 8 : i32
    %0 = arith.muli %arg0, %c8_i32 : i32
    %c0_i32 = arith.constant 0 : i32
    %1 = arith.addi %0, %c0_i32 : i32
    %2 = arith.index_cast %1 : i32 to index
    %3 = memref.load %arg1[%2] : memref<8xi32, #tpu.memory_space<smem>>
    %4 = arith.index_cast %3 : i32 to index
    %5 = memref.load %arg2[%4] : memref<32xi32, #tpu.memory_space<smem>>
    %c0_i32_0 = arith.constant 0 : i32
    %c31_i32 = arith.constant 31 : i32
    %6 = arith.maxsi %c0_i32_0, %5 : i32
    %7 = arith.minsi %c31_i32, %6 : i32
    %c0_i32_1 = arith.constant 0 : i32
    %c0_i32_2 = arith.constant 0 : i32
    %8 = tpu.memref_slice %arg3[%7, %c0_i32_2] : memref<32x32xf32, #tpu.memory_space<any>> -> memref<1x32xf32, #tpu.memory_space<any>>
    %c0_i32_3 = arith.constant 0 : i32
    %c0_i32_4 = arith.constant 0 : i32
    %9 = tpu.memref_slice %arg6[%c0_i32_3, %c0_i32_4] : memref<8x32xf32, #tpu.memory_space<vmem>> -> memref<1x32xf32, #tpu.memory_space<vmem>>
    %10 = tpu.memref_slice %arg7[%c0_i32_1] : memref<8x!tpu.dma_semaphore, #tpu.memory_space<semaphore_mem>> -> memref<1x!tpu.dma_semaphore, #tpu.memory_space<semaphore_mem>>
    %11 = tpu.memref_squeeze %10 : memref<1x!tpu.dma_semaphore, #tpu.memory_space<semaphore_mem>> -> memref<!tpu.dma_semaphore, #tpu.memory_space<semaphore_mem>>
    tpu.enqueue_dma source(%8 : memref<1x32xf32, #tpu.memory_space<any>>) target(%9 : memref<1x32xf32, #tpu.memory_space<vmem>>) target_semaphore(%11 : memref<!tpu.dma_semaphore, #tpu.memory_space<semaphore_mem>>)
    %c8_i32_5 = arith.constant 8 : i32
    %12 = arith.muli %arg0, %c8_i32_5 : i32
    %c1_i32 = arith.constant 1 : i32
    %13 = arith.addi %12, %c1_i32 : i32
    %14 = arith.index_cast %13 : i32 to index
    %15 = memref.load %arg1[%14] : memref<8xi32, #tpu.memory_space<smem>>
    %16 = arith.index_cast %15 : i32 to index
    %17 = memref.load %arg2[%16] : memref<32xi32, #tpu.memory_space<smem>>
    %c0_i32_6 = arith.constant 0 : i32
    %c31_i32_7 = arith.constant 31 : i32
    %18 = arith.maxsi %c0_i32_6, %17 : i32
    %19 = arith.minsi %c31_i32_7, %18 : i32
    %c1_i32_8 = arith.constant 1 : i32
    %c0_i32_9 = arith.constant 0 : i32
    %20 = tpu.memref_slice %arg3[%19, %c0_i32_9] : memref<32x32xf32, #tpu.memory_space<any>> -> memref<1x32xf32, #tpu.memory_space<any>>
    %c1_i32_10 = arith.constant 1 : i32
    %c0_i32_11 = arith.constant 0 : i32
    %21 = tpu.memref_slice %arg6[%c1_i32_10, %c0_i32_11] : memref<8x32xf32, #tpu.memory_space<vmem>> -> memref<1x32xf32, #tpu.memory_space<vmem>>
    %22 = tpu.memref_slice %arg7[%c1_i32_8] : memref<8x!tpu.dma_semaphore, #tpu.memory_space<semaphore_mem>> -> memref<1x!tpu.dma_semaphore, #tpu.memory_space<semaphore_mem>>
    %23 = tpu.memref_squeeze %22 : memref<1x!tpu.dma_semaphore, #tpu.memory_space<semaphore_mem>> -> memref<!tpu.dma_semaphore, #tpu.memory_space<semaphore_mem>>
    tpu.enqueue_dma source(%20 : memref<1x32xf32, #tpu.memory_space<any>>) target(%21 : memref<1x32xf32, #tpu.memory_space<vmem>>) target_semaphore(%23 : memref<!tpu.dma_semaphore, #tpu.memory_space<semaphore_mem>>)
    %c8_i32_12 = arith.constant 8 : i32
    %24 = arith.muli %arg0, %c8_i32_12 : i32
    %c2_i32 = arith.constant 2 : i32
    %25 = arith.addi %24, %c2_i32 : i32
    %26 = arith.index_cast %25 : i32 to index
    %27 = memref.load %arg1[%26] : memref<8xi32, #tpu.memory_space<smem>>
    %28 = arith.index_cast %27 : i32 to index
    %29 = memref.load %arg2[%28] : memref<32xi32, #tpu.memory_space<smem>>
    %c0_i32_13 = arith.constant 0 : i32
    %c31_i32_14 = arith.constant 31 : i32
    %30 = arith.maxsi %c0_i32_13, %29 : i32
    %31 = arith.minsi %c31_i32_14, %30 : i32
    %c2_i32_15 = arith.constant 2 : i32
    %c0_i32_16 = arith.constant 0 : i32
    %32 = tpu.memref_slice %arg3[%31, %c0_i32_16] : memref<32x32xf32, #tpu.memory_space<any>> -> memref<1x32xf32, #tpu.memory_space<any>>
    %c2_i32_17 = arith.constant 2 : i32
    %c0_i32_18 = arith.constant 0 : i32
    %33 = tpu.memref_slice %arg6[%c2_i32_17, %c0_i32_18] : memref<8x32xf32, #tpu.memory_space<vmem>> -> memref<1x32xf32, #tpu.memory_space<vmem>>
    %34 = tpu.memref_slice %arg7[%c2_i32_15] : memref<8x!tpu.dma_semaphore, #tpu.memory_space<semaphore_mem>> -> memref<1x!tpu.dma_semaphore, #tpu.memory_space<semaphore_mem>>
    %35 = tpu.memref_squeeze %34 : memref<1x!tpu.dma_semaphore, #tpu.memory_space<semaphore_mem>> -> memref<!tpu.dma_semaphore, #tpu.memory_space<semaphore_mem>>
    tpu.enqueue_dma source(%32 : memref<1x32xf32, #tpu.memory_space<any>>) target(%33 : memref<1x32xf32, #tpu.memory_space<vmem>>) target_semaphore(%35 : memref<!tpu.dma_semaphore, #tpu.memory_space<semaphore_mem>>)
    %c8_i32_19 = arith.constant 8 : i32
    %36 = arith.muli %arg0, %c8_i32_19 : i32
    %c3_i32 = arith.constant 3 : i32
    %37 = arith.addi %36, %c3_i32 : i32
    %38 = arith.index_cast %37 : i32 to index
    %39 = memref.load %arg1[%38] : memref<8xi32, #tpu.memory_space<smem>>
    %40 = arith.index_cast %39 : i32 to index
    %41 = memref.load %arg2[%40] : memref<32xi32, #tpu.memory_space<smem>>
    %c0_i32_20 = arith.constant 0 : i32
    %c31_i32_21 = arith.constant 31 : i32
    %42 = arith.maxsi %c0_i32_20, %41 : i32
    %43 = arith.minsi %c31_i32_21, %42 : i32
    %c3_i32_22 = arith.constant 3 : i32
    %c0_i32_23 = arith.constant 0 : i32
    %44 = tpu.memref_slice %arg3[%43, %c0_i32_23] : memref<32x32xf32, #tpu.memory_space<any>> -> memref<1x32xf32, #tpu.memory_space<any>>
    %c3_i32_24 = arith.constant 3 : i32
    %c0_i32_25 = arith.constant 0 : i32
    %45 = tpu.memref_slice %arg6[%c3_i32_24, %c0_i32_25] : memref<8x32xf32, #tpu.memory_space<vmem>> -> memref<1x32xf32, #tpu.memory_space<vmem>>
    %46 = tpu.memref_slice %arg7[%c3_i32_22] : memref<8x!tpu.dma_semaphore, #tpu.memory_space<semaphore_mem>> -> memref<1x!tpu.dma_semaphore, #tpu.memory_space<semaphore_mem>>
    %47 = tpu.memref_squeeze %46 : memref<1x!tpu.dma_semaphore, #tpu.memory_space<semaphore_mem>> -> memref<!tpu.dma_semaphore, #tpu.memory_space<semaphore_mem>>
    tpu.enqueue_dma source(%44 : memref<1x32xf32, #tpu.memory_space<any>>) target(%45 : memref<1x32xf32, #tpu.memory_space<vmem>>) target_semaphore(%47 : memref<!tpu.dma_semaphore, #tpu.memory_space<semaphore_mem>>)
    %c8_i32_26 = arith.constant 8 : i32
    %48 = arith.muli %arg0, %c8_i32_26 : i32
    %c4_i32 = arith.constant 4 : i32
    %49 = arith.addi %48, %c4_i32 : i32
    %50 = arith.index_cast %49 : i32 to index
    %51 = memref.load %arg1[%50] : memref<8xi32, #tpu.memory_space<smem>>
    %52 = arith.index_cast %51 : i32 to index
    %53 = memref.load %arg2[%52] : memref<32xi32, #tpu.memory_space<smem>>
    %c0_i32_27 = arith.constant 0 : i32
    %c31_i32_28 = arith.constant 31 : i32
    %54 = arith.maxsi %c0_i32_27, %53 : i32
    %55 = arith.minsi %c31_i32_28, %54 : i32
    %c4_i32_29 = arith.constant 4 : i32
    %c0_i32_30 = arith.constant 0 : i32
    %56 = tpu.memref_slice %arg3[%55, %c0_i32_30] : memref<32x32xf32, #tpu.memory_space<any>> -> memref<1x32xf32, #tpu.memory_space<any>>
    %c4_i32_31 = arith.constant 4 : i32
    %c0_i32_32 = arith.constant 0 : i32
    %57 = tpu.memref_slice %arg6[%c4_i32_31, %c0_i32_32] : memref<8x32xf32, #tpu.memory_space<vmem>> -> memref<1x32xf32, #tpu.memory_space<vmem>>
    %58 = tpu.memref_slice %arg7[%c4_i32_29] : memref<8x!tpu.dma_semaphore, #tpu.memory_space<semaphore_mem>> -> memref<1x!tpu.dma_semaphore, #tpu.memory_space<semaphore_mem>>
    %59 = tpu.memref_squeeze %58 : memref<1x!tpu.dma_semaphore, #tpu.memory_space<semaphore_mem>> -> memref<!tpu.dma_semaphore, #tpu.memory_space<semaphore_mem>>
    tpu.enqueue_dma source(%56 : memref<1x32xf32, #tpu.memory_space<any>>) target(%57 : memref<1x32xf32, #tpu.memory_space<vmem>>) target_semaphore(%59 : memref<!tpu.dma_semaphore, #tpu.memory_space<semaphore_mem>>)
    %c8_i32_33 = arith.constant 8 : i32
    %60 = arith.muli %arg0, %c8_i32_33 : i32
    %c5_i32 = arith.constant 5 : i32
    %61 = arith.addi %60, %c5_i32 : i32
    %62 = arith.index_cast %61 : i32 to index
    %63 = memref.load %arg1[%62] : memref<8xi32, #tpu.memory_space<smem>>
    %64 = arith.index_cast %63 : i32 to index
    %65 = memref.load %arg2[%64] : memref<32xi32, #tpu.memory_space<smem>>
    %c0_i32_34 = arith.constant 0 : i32
    %c31_i32_35 = arith.constant 31 : i32
    %66 = arith.maxsi %c0_i32_34, %65 : i32
    %67 = arith.minsi %c31_i32_35, %66 : i32
    %c5_i32_36 = arith.constant 5 : i32
    %c0_i32_37 = arith.constant 0 : i32
    %68 = tpu.memref_slice %arg3[%67, %c0_i32_37] : memref<32x32xf32, #tpu.memory_space<any>> -> memref<1x32xf32, #tpu.memory_space<any>>
    %c5_i32_38 = arith.constant 5 : i32
    %c0_i32_39 = arith.constant 0 : i32
    %69 = tpu.memref_slice %arg6[%c5_i32_38, %c0_i32_39] : memref<8x32xf32, #tpu.memory_space<vmem>> -> memref<1x32xf32, #tpu.memory_space<vmem>>
    %70 = tpu.memref_slice %arg7[%c5_i32_36] : memref<8x!tpu.dma_semaphore, #tpu.memory_space<semaphore_mem>> -> memref<1x!tpu.dma_semaphore, #tpu.memory_space<semaphore_mem>>
    %71 = tpu.memref_squeeze %70 : memref<1x!tpu.dma_semaphore, #tpu.memory_space<semaphore_mem>> -> memref<!tpu.dma_semaphore, #tpu.memory_space<semaphore_mem>>
    tpu.enqueue_dma source(%68 : memref<1x32xf32, #tpu.memory_space<any>>) target(%69 : memref<1x32xf32, #tpu.memory_space<vmem>>) target_semaphore(%71 : memref<!tpu.dma_semaphore, #tpu.memory_space<semaphore_mem>>)
    %c8_i32_40 = arith.constant 8 : i32
    %72 = arith.muli %arg0, %c8_i32_40 : i32
    %c6_i32 = arith.constant 6 : i32
    %73 = arith.addi %72, %c6_i32 : i32
    %74 = arith.index_cast %73 : i32 to index
    %75 = memref.load %arg1[%74] : memref<8xi32, #tpu.memory_space<smem>>
    %76 = arith.index_cast %75 : i32 to index
    %77 = memref.load %arg2[%76] : memref<32xi32, #tpu.memory_space<smem>>
    %c0_i32_41 = arith.constant 0 : i32
    %c31_i32_42 = arith.constant 31 : i32
    %78 = arith.maxsi %c0_i32_41, %77 : i32
    %79 = arith.minsi %c31_i32_42, %78 : i32
    %c6_i32_43 = arith.constant 6 : i32
    %c0_i32_44 = arith.constant 0 : i32
    %80 = tpu.memref_slice %arg3[%79, %c0_i32_44] : memref<32x32xf32, #tpu.memory_space<any>> -> memref<1x32xf32, #tpu.memory_space<any>>
    %c6_i32_45 = arith.constant 6 : i32
    %c0_i32_46 = arith.constant 0 : i32
    %81 = tpu.memref_slice %arg6[%c6_i32_45, %c0_i32_46] : memref<8x32xf32, #tpu.memory_space<vmem>> -> memref<1x32xf32, #tpu.memory_space<vmem>>
    %82 = tpu.memref_slice %arg7[%c6_i32_43] : memref<8x!tpu.dma_semaphore, #tpu.memory_space<semaphore_mem>> -> memref<1x!tpu.dma_semaphore, #tpu.memory_space<semaphore_mem>>
    %83 = tpu.memref_squeeze %82 : memref<1x!tpu.dma_semaphore, #tpu.memory_space<semaphore_mem>> -> memref<!tpu.dma_semaphore, #tpu.memory_space<semaphore_mem>>
    tpu.enqueue_dma source(%80 : memref<1x32xf32, #tpu.memory_space<any>>) target(%81 : memref<1x32xf32, #tpu.memory_space<vmem>>) target_semaphore(%83 : memref<!tpu.dma_semaphore, #tpu.memory_space<semaphore_mem>>)
    %c8_i32_47 = arith.constant 8 : i32
    %84 = arith.muli %arg0, %c8_i32_47 : i32
    %c7_i32 = arith.constant 7 : i32
    %85 = arith.addi %84, %c7_i32 : i32
    %86 = arith.index_cast %85 : i32 to index
    %87 = memref.load %arg1[%86] : memref<8xi32, #tpu.memory_space<smem>>
    %88 = arith.index_cast %87 : i32 to index
    %89 = memref.load %arg2[%88] : memref<32xi32, #tpu.memory_space<smem>>
    %c0_i32_48 = arith.constant 0 : i32
    %c31_i32_49 = arith.constant 31 : i32
    %90 = arith.maxsi %c0_i32_48, %89 : i32
    %91 = arith.minsi %c31_i32_49, %90 : i32
    %c7_i32_50 = arith.constant 7 : i32
    %c0_i32_51 = arith.constant 0 : i32
    %92 = tpu.memref_slice %arg3[%91, %c0_i32_51] : memref<32x32xf32, #tpu.memory_space<any>> -> memref<1x32xf32, #tpu.memory_space<any>>
    %c7_i32_52 = arith.constant 7 : i32
    %c0_i32_53 = arith.constant 0 : i32
    %93 = tpu.memref_slice %arg6[%c7_i32_52, %c0_i32_53] : memref<8x32xf32, #tpu.memory_space<vmem>> -> memref<1x32xf32, #tpu.memory_space<vmem>>
    %94 = tpu.memref_slice %arg7[%c7_i32_50] : memref<8x!tpu.dma_semaphore, #tpu.memory_space<semaphore_mem>> -> memref<1x!tpu.dma_semaphore, #tpu.memory_space<semaphore_mem>>
    %95 = tpu.memref_squeeze %94 : memref<1x!tpu.dma_semaphore, #tpu.memory_space<semaphore_mem>> -> memref<!tpu.dma_semaphore, #tpu.memory_space<semaphore_mem>>
    tpu.enqueue_dma source(%92 : memref<1x32xf32, #tpu.memory_space<any>>) target(%93 : memref<1x32xf32, #tpu.memory_space<vmem>>) target_semaphore(%95 : memref<!tpu.dma_semaphore, #tpu.memory_space<semaphore_mem>>)
    %c0_i32_54 = arith.constant 0 : i32
    %c0_i32_55 = arith.constant 0 : i32
    %96 = tpu.memref_slice %arg3[%7, %c0_i32_55] : memref<32x32xf32, #tpu.memory_space<any>> -> memref<1x32xf32, #tpu.memory_space<any>>
    %c0_i32_56 = arith.constant 0 : i32
    %c0_i32_57 = arith.constant 0 : i32
    %97 = tpu.memref_slice %arg6[%c0_i32_56, %c0_i32_57] : memref<8x32xf32, #tpu.memory_space<vmem>> -> memref<1x32xf32, #tpu.memory_space<vmem>>
    %98 = tpu.memref_slice %arg7[%c0_i32_54] : memref<8x!tpu.dma_semaphore, #tpu.memory_space<semaphore_mem>> -> memref<1x!tpu.dma_semaphore, #tpu.memory_space<semaphore_mem>>
    %99 = tpu.memref_squeeze %98 : memref<1x!tpu.dma_semaphore, #tpu.memory_space<semaphore_mem>> -> memref<!tpu.dma_semaphore, #tpu.memory_space<semaphore_mem>>
    tpu.wait_dma2 semaphore(%99 : memref<!tpu.dma_semaphore, #tpu.memory_space<semaphore_mem>>) src(%96 : memref<1x32xf32, #tpu.memory_space<any>>) dst(%97 : memref<1x32xf32, #tpu.memory_space<vmem>>)
    %c1_i32_58 = arith.constant 1 : i32
    %c0_i32_59 = arith.constant 0 : i32
    %100 = tpu.memref_slice %arg3[%19, %c0_i32_59] : memref<32x32xf32, #tpu.memory_space<any>> -> memref<1x32xf32, #tpu.memory_space<any>>
    %c1_i32_60 = arith.constant 1 : i32
    %c0_i32_61 = arith.constant 0 : i32
    %101 = tpu.memref_slice %arg6[%c1_i32_60, %c0_i32_61] : memref<8x32xf32, #tpu.memory_space<vmem>> -> memref<1x32xf32, #tpu.memory_space<vmem>>
    %102 = tpu.memref_slice %arg7[%c1_i32_58] : memref<8x!tpu.dma_semaphore, #tpu.memory_space<semaphore_mem>> -> memref<1x!tpu.dma_semaphore, #tpu.memory_space<semaphore_mem>>
    %103 = tpu.memref_squeeze %102 : memref<1x!tpu.dma_semaphore, #tpu.memory_space<semaphore_mem>> -> memref<!tpu.dma_semaphore, #tpu.memory_space<semaphore_mem>>
    tpu.wait_dma2 semaphore(%103 : memref<!tpu.dma_semaphore, #tpu.memory_space<semaphore_mem>>) src(%100 : memref<1x32xf32, #tpu.memory_space<any>>) dst(%101 : memref<1x32xf32, #tpu.memory_space<vmem>>)
    %c2_i32_62 = arith.constant 2 : i32
    %c0_i32_63 = arith.constant 0 : i32
    %104 = tpu.memref_slice %arg3[%31, %c0_i32_63] : memref<32x32xf32, #tpu.memory_space<any>> -> memref<1x32xf32, #tpu.memory_space<any>>
    %c2_i32_64 = arith.constant 2 : i32
    %c0_i32_65 = arith.constant 0 : i32
    %105 = tpu.memref_slice %arg6[%c2_i32_64, %c0_i32_65] : memref<8x32xf32, #tpu.memory_space<vmem>> -> memref<1x32xf32, #tpu.memory_space<vmem>>
    %106 = tpu.memref_slice %arg7[%c2_i32_62] : memref<8x!tpu.dma_semaphore, #tpu.memory_space<semaphore_mem>> -> memref<1x!tpu.dma_semaphore, #tpu.memory_space<semaphore_mem>>
    %107 = tpu.memref_squeeze %106 : memref<1x!tpu.dma_semaphore, #tpu.memory_space<semaphore_mem>> -> memref<!tpu.dma_semaphore, #tpu.memory_space<semaphore_mem>>
    tpu.wait_dma2 semaphore(%107 : memref<!tpu.dma_semaphore, #tpu.memory_space<semaphore_mem>>) src(%104 : memref<1x32xf32, #tpu.memory_space<any>>) dst(%105 : memref<1x32xf32, #tpu.memory_space<vmem>>)
    %c3_i32_66 = arith.constant 3 : i32
    %c0_i32_67 = arith.constant 0 : i32
    %108 = tpu.memref_slice %arg3[%43, %c0_i32_67] : memref<32x32xf32, #tpu.memory_space<any>> -> memref<1x32xf32, #tpu.memory_space<any>>
    %c3_i32_68 = arith.constant 3 : i32
    %c0_i32_69 = arith.constant 0 : i32
    %109 = tpu.memref_slice %arg6[%c3_i32_68, %c0_i32_69] : memref<8x32xf32, #tpu.memory_space<vmem>> -> memref<1x32xf32, #tpu.memory_space<vmem>>
    %110 = tpu.memref_slice %arg7[%c3_i32_66] : memref<8x!tpu.dma_semaphore, #tpu.memory_space<semaphore_mem>> -> memref<1x!tpu.dma_semaphore, #tpu.memory_space<semaphore_mem>>
    %111 = tpu.memref_squeeze %110 : memref<1x!tpu.dma_semaphore, #tpu.memory_space<semaphore_mem>> -> memref<!tpu.dma_semaphore, #tpu.memory_space<semaphore_mem>>
    tpu.wait_dma2 semaphore(%111 : memref<!tpu.dma_semaphore, #tpu.memory_space<semaphore_mem>>) src(%108 : memref<1x32xf32, #tpu.memory_space<any>>) dst(%109 : memref<1x32xf32, #tpu.memory_space<vmem>>)
    %c4_i32_70 = arith.constant 4 : i32
    %c0_i32_71 = arith.constant 0 : i32
    %112 = tpu.memref_slice %arg3[%55, %c0_i32_71] : memref<32x32xf32, #tpu.memory_space<any>> -> memref<1x32xf32, #tpu.memory_space<any>>
    %c4_i32_72 = arith.constant 4 : i32
    %c0_i32_73 = arith.constant 0 : i32
    %113 = tpu.memref_slice %arg6[%c4_i32_72, %c0_i32_73] : memref<8x32xf32, #tpu.memory_space<vmem>> -> memref<1x32xf32, #tpu.memory_space<vmem>>
    %114 = tpu.memref_slice %arg7[%c4_i32_70] : memref<8x!tpu.dma_semaphore, #tpu.memory_space<semaphore_mem>> -> memref<1x!tpu.dma_semaphore, #tpu.memory_space<semaphore_mem>>
    %115 = tpu.memref_squeeze %114 : memref<1x!tpu.dma_semaphore, #tpu.memory_space<semaphore_mem>> -> memref<!tpu.dma_semaphore, #tpu.memory_space<semaphore_mem>>
    tpu.wait_dma2 semaphore(%115 : memref<!tpu.dma_semaphore, #tpu.memory_space<semaphore_mem>>) src(%112 : memref<1x32xf32, #tpu.memory_space<any>>) dst(%113 : memref<1x32xf32, #tpu.memory_space<vmem>>)
    %c5_i32_74 = arith.constant 5 : i32
    %c0_i32_75 = arith.constant 0 : i32
    %116 = tpu.memref_slice %arg3[%67, %c0_i32_75] : memref<32x32xf32, #tpu.memory_space<any>> -> memref<1x32xf32, #tpu.memory_space<any>>
    %c5_i32_76 = arith.constant 5 : i32
    %c0_i32_77 = arith.constant 0 : i32
    %117 = tpu.memref_slice %arg6[%c5_i32_76, %c0_i32_77] : memref<8x32xf32, #tpu.memory_space<vmem>> -> memref<1x32xf32, #tpu.memory_space<vmem>>
    %118 = tpu.memref_slice %arg7[%c5_i32_74] : memref<8x!tpu.dma_semaphore, #tpu.memory_space<semaphore_mem>> -> memref<1x!tpu.dma_semaphore, #tpu.memory_space<semaphore_mem>>
    %119 = tpu.memref_squeeze %118 : memref<1x!tpu.dma_semaphore, #tpu.memory_space<semaphore_mem>> -> memref<!tpu.dma_semaphore, #tpu.memory_space<semaphore_mem>>
    tpu.wait_dma2 semaphore(%119 : memref<!tpu.dma_semaphore, #tpu.memory_space<semaphore_mem>>) src(%116 : memref<1x32xf32, #tpu.memory_space<any>>) dst(%117 : memref<1x32xf32, #tpu.memory_space<vmem>>)
    %c6_i32_78 = arith.constant 6 : i32
    %c0_i32_79 = arith.constant 0 : i32
    %120 = tpu.memref_slice %arg3[%79, %c0_i32_79] : memref<32x32xf32, #tpu.memory_space<any>> -> memref<1x32xf32, #tpu.memory_space<any>>
    %c6_i32_80 = arith.constant 6 : i32
    %c0_i32_81 = arith.constant 0 : i32
    %121 = tpu.memref_slice %arg6[%c6_i32_80, %c0_i32_81] : memref<8x32xf32, #tpu.memory_space<vmem>> -> memref<1x32xf32, #tpu.memory_space<vmem>>
    %122 = tpu.memref_slice %arg7[%c6_i32_78] : memref<8x!tpu.dma_semaphore, #tpu.memory_space<semaphore_mem>> -> memref<1x!tpu.dma_semaphore, #tpu.memory_space<semaphore_mem>>
    %123 = tpu.memref_squeeze %122 : memref<1x!tpu.dma_semaphore, #tpu.memory_space<semaphore_mem>> -> memref<!tpu.dma_semaphore, #tpu.memory_space<semaphore_mem>>
    tpu.wait_dma2 semaphore(%123 : memref<!tpu.dma_semaphore, #tpu.memory_space<semaphore_mem>>) src(%120 : memref<1x32xf32, #tpu.memory_space<any>>) dst(%121 : memref<1x32xf32, #tpu.memory_space<vmem>>)
    %c7_i32_82 = arith.constant 7 : i32
    %c0_i32_83 = arith.constant 0 : i32
    %124 = tpu.memref_slice %arg3[%91, %c0_i32_83] : memref<32x32xf32, #tpu.memory_space<any>> -> memref<1x32xf32, #tpu.memory_space<any>>
    %c7_i32_84 = arith.constant 7 : i32
    %c0_i32_85 = arith.constant 0 : i32
    %125 = tpu.memref_slice %arg6[%c7_i32_84, %c0_i32_85] : memref<8x32xf32, #tpu.memory_space<vmem>> -> memref<1x32xf32, #tpu.memory_space<vmem>>
    %126 = tpu.memref_slice %arg7[%c7_i32_82] : memref<8x!tpu.dma_semaphore, #tpu.memory_space<semaphore_mem>> -> memref<1x!tpu.dma_semaphore, #tpu.memory_space<semaphore_mem>>
    %127 = tpu.memref_squeeze %126 : memref<1x!tpu.dma_semaphore, #tpu.memory_space<semaphore_mem>> -> memref<!tpu.dma_semaphore, #tpu.memory_space<semaphore_mem>>
    tpu.wait_dma2 semaphore(%127 : memref<!tpu.dma_semaphore, #tpu.memory_space<semaphore_mem>>) src(%124 : memref<1x32xf32, #tpu.memory_space<any>>) dst(%125 : memref<1x32xf32, #tpu.memory_space<vmem>>)
    %c0 = arith.constant 0 : index
    %c0_86 = arith.constant 0 : index
    %128 = vector.load %arg6[%c0, %c0_86] : memref<8x32xf32, #tpu.memory_space<vmem>>, vector<8x32xf32>
    %c0_87 = arith.constant 0 : index
    %c0_88 = arith.constant 0 : index
    %129 = vector.load %arg5[%c0_87, %c0_88] : memref<8x64xf32, #tpu.memory_space<vmem>>, vector<8x32xf32>
    tpu.vector_store %arg5[%c0_87, %c0_88], %128 {strides = array<i32>} : memref<8x64xf32, #tpu.memory_space<vmem>>, vector<8x32xf32>,
    %c0_89 = arith.constant 0 : index
    %c0_90 = arith.constant 0 : index
    %130 = vector.load %arg4[%c0_89, %c0_90] : memref<8x32xf32, #tpu.memory_space<vmem>>, vector<8x32xf32>
    %c0_91 = arith.constant 0 : index
    %c32 = arith.constant 32 : index
    %131 = vector.load %arg5[%c0_91, %c32] : memref<8x64xf32, #tpu.memory_space<vmem>>, vector<8x32xf32>
    tpu.vector_store %arg5[%c0_91, %c32], %130 {strides = array<i32>} : memref<8x64xf32, #tpu.memory_space<vmem>>, vector<8x32xf32>,
    return
  }
  func.func @transform_1(%arg0: i32, %arg1: memref<8xi32, #tpu.memory_space<smem>>, %arg2: memref<32xi32, #tpu.memory_space<smem>>) -> (i32, i32) {
    %c0_i32 = arith.constant 0 : i32
    %c0_i32_0 = arith.constant 0 : i32
    return %arg0, %c0_i32 : i32, i32
  }
  func.func @transform_2(%arg0: i32, %arg1: memref<8xi32, #tpu.memory_space<smem>>, %arg2: memref<32xi32, #tpu.memory_space<smem>>) -> (i32, i32) {
    %c0_i32 = arith.constant 0 : i32
    %c0_i32_0 = arith.constant 0 : i32
    return %arg0, %c0_i32 : i32, i32
  }
}

</mosaic_0001>

<bundles_post_ra>
// kernel: tpu_custom_call.1
= control target key start
LH: loop header
LB: loop body
LE: loop exit
PB: predicated region body
PF: predicated region fallthrough
CT: control target
= control target key end

     0   :  { %s698_s21 = smov [#allocation5]   ;;  %s699_s22 = smov [#allocation6]   ;;  %s884_s0 = inlined_call_operand.hbm [shape: s32[8], index: 0, kind: input, shape index: {}]   ;;  %s885_s2 = inlined_call_operand.hbm [shape: f32[32,32], index: 2, kind: input, shape index: {}]   ;;  %s886_s3 = inlined_call_operand.hbm [shape: f32[8,32], index: 3, kind: input, shape index: {}]   ;;  %s887_s4 = inlined_call_operand.hbm [shape: f32[8,64], index: 4, kind: output, shape index: {}]   ;;  %s888_s1 = inlined_call_operand.hbm [shape: s32[32], index: 1, kind: input, shape index: {}]  }
   0x1   :  { %s10_s17 = sshll.u32 %s884_s0, 4  ;;  %s15_s20 = sshll.u32 %s888_s1, 4  ;;  %s11_s17 = int_to_ptr.hbm [resolvable:$true] %s10_s17  ;;  %s16_s20 = int_to_ptr.hbm [resolvable:$true] %s15_s20 }
   0x2   :  { %13 = dma.hbm_to_smem %s11_s17, 16, %s698_s21, [#allocation4] }
   0x3   :  { %18 = dma.hbm_to_smem %s16_s20, 16, %s699_s22, [#allocation4] }
   0x4   :  { %676 = dma.done.wait [#allocation4], 32 }
   0x5   :  { %677 = vsyncadd [#allocation4], 4294967264 }
   0x6   :  { %21 = sfence }
   0x7   :  { %22 = vsyncpa [#allocation8], 0 }
   0x8   :  { %23 = vsyncpa [#allocation9], 0  ;;  %s29_s25 = sshll.u32 %s886_s3, 4  ;;  %s700_s0 = smov [#allocation7]   ;;  %s30_s25 = int_to_ptr.hbm [resolvable:$true] %s29_s25 }
   0x9   :  { %s31_s26 = sshll.u32 %s700_s0, 4  ;;  %s32_s26 = int_to_ptr.vmem [resolvable:$true] %s31_s26 }
   0xa   :  { %34 = dma.hbm_to_vmem [thread:$0]  %s30_s25, 128, %s32_s26, [#allocation8]  }
   0xb   :  { %678 = dma.done.wait [#allocation8], 128  }
   0xc   :  { %679 = vsyncadd [#allocation8], 4294967168  ;;  %s40_s1 = sld [smem:[#allocation5]]  ;;  %s701_s27 = smov [#allocation2]  }
   0xd   :  { %s745_s28 = sshll.u32 %s701_s27, 4  ;;  %s333_s29 = sld [smem:[#allocation5 + $0x1]]  ;;  %s57_s28 = int_to_ptr.vmem [resolvable:$true] %s745_s28 }
   0xe   :  { %s339_s30 = sld [smem:[#allocation5 + $0x2]]  ;;  %s702_s6 = smov [#allocation2 + $0x1]  }
   0xf   :  { %s345_s5 = sld [smem:[#allocation5 + $0x3]]  ;;  %s748_s7 = sshll.u32 %s702_s6, 4  ;;  %s80_s7 = int_to_ptr.vmem [resolvable:$true] %s748_s7 }
  0x10   :  { %s703_s8 = smov [#allocation2 + $0x2]   ;;  %s704_s11 = smov [#allocation2 + $0x3]  }
  0x11   :  { %s750_s9 = sshll.u32 %s703_s8, 4  ;;  %s752_s12 = sshll.u32 %s704_s11, 4  ;;  %s103_s9 = int_to_ptr.vmem [resolvable:$true] %s750_s9  ;;  %s126_s12 = int_to_ptr.vmem [resolvable:$true] %s752_s12 }
  0x12   :  { %s41_s3 = sld [smem:[#allocation6 + %s40_s1]]  ;;  %s775_s27 = scalar_lea.hbm %s885_s2, 32 }
  0x13   :  { %s62_s10 = sld [smem:[#allocation6 + %s333_s29]] }
  0x14   :  { %s755_s13 = sld [smem:[#allocation6 + %s339_s30]] }
  0x15   :  { %s758_s14 = sld [smem:[#allocation5 + $0x4]] }
  0x16   :  { %s760_s15 = sld [smem:[#allocation6 + %s345_s5]] }
  0x17   :  { %s763_s16 = sld [smem:[#allocation5 + $0x5]] }
  0x18   :  { %p42_p0 = scmp.gt.s32.totalorder %s41_s3, 0  ;;  %p328_p1 = scmp.lt.s32.totalorder %s41_s3, 31 }
  0x19   :  { %p63_p2 = scmp.gt.s32.totalorder %s62_s10, 0  ;;  %p334_p3 = scmp.lt.s32.totalorder %s62_s10, 31 }
  0x1a   :  { %s890_s3 = smov (!%p42_p0, %s41_s3), 0  ;;  %p86_p4 = scmp.gt.s32.totalorder %s755_s13, 0 }
  0x1b   :  { %s892_s10 = smov (!%p63_p2, %s62_s10), 0  ;;  %s894_s3 = smov (!%p328_p1, %s890_s3), 31 }
  0x1c   :  { %s896_s10 = smov (!%p334_p3, %s892_s10), 31  ;;  %s46_s19 = scalar_lea.hbm %s885_s2, %s894_s3 }
  0x1d   :  { %s54_s20 = sshll.u32 %s46_s19, 4  ;;  %s67_s23 = scalar_lea.hbm %s885_s2, %s896_s10  ;;  %s55_s20 = int_to_ptr.hbm [resolvable:$true] %s54_s20 }
  0x1e   :  { %s77_s24 = sshll.u32 %s67_s23, 4  ;;  %s460_s25 = sshra.s32 %s55_s20, 4  ;;  %s461_s25 = int_to_ptr.hbm [resolvable:$true] %s460_s25  ;;  %s78_s24 = int_to_ptr.hbm [resolvable:$true] %s77_s24 }
  0x1f   :  { %s462_s0 = scalar_lea.hbm %s461_s25, 1  ;;  %p465_p6 = scmp.lt.s32.totalorder %s461_s25, %s885_s2 }
  0x20   :  { %p463_p5 = scmp.ne.s32.totalorder %s461_s25, %s462_s0  ;;  %p466_p7 = scmp.lt.s32.totalorder %s775_s27, %s462_s0 }
  0x22   :  { %p467_p8 = por %p466_p7, %p465_p6 }
  0x24   :  { %p468_p9 = pnand %p467_p8, %p463_p5 }
  0x26   :  { %471 = shalt.err (!%p468_p9)  }
  0x27   :  { %59 = dma.hbm_to_vmem [thread:$0]  %s55_s20, 16, %s57_s28, [#allocation3] }
  0x28   :  { %p340_p10 = scmp.lt.s32.totalorder %s755_s13, 31  ;;  %s484_s5 = sshra.s32 %s78_s24, 4  ;;  %s485_s5 = int_to_ptr.hbm [resolvable:$true] %s484_s5 }
  0x29   :  { %s486_s6 = scalar_lea.hbm %s485_s5, 1  ;;  %p489_p12 = scmp.lt.s32.totalorder %s485_s5, %s885_s2 }
  0x2a   :  { %p487_p11 = scmp.ne.s32.totalorder %s485_s5, %s486_s6  ;;  %p490_p13 = scmp.lt.s32.totalorder %s775_s27, %s486_s6 }
  0x2c   :  { %p491_p0 = por %p490_p13, %p489_p12 }
  0x2e   :  { %p492_p1 = pnand %p491_p0, %p487_p11 }
  0x30   :  { %495 = shalt.err (!%p492_p1)  }
  0x31   :  { %82 = dma.hbm_to_vmem [thread:$0]  %s78_s24, 16, %s80_s7, [#allocation3 + $0x1] }
  0x32   :  { %s87_s28 = scalar_select %p86_p4, %s755_s13, 0 }
  0x33   :  { %p109_p2 = scmp.gt.s32.totalorder %s760_s15, 0  ;;  %p346_p3 = scmp.lt.s32.totalorder %s760_s15, 31 }
  0x34   :  { %s898_s28 = smov (!%p340_p10, %s87_s28), 31  ;;  %s802_s19 = sld [smem:[#allocation6 + %s758_s14]] }
  0x35   :  { %s110_s10 = scalar_select %p109_p2, %s760_s15, 0 }
  0x36   :  { %s90_s18 = scalar_lea.hbm %s885_s2, %s898_s28  ;;  %s805_s21 = sld [smem:[#allocation6 + %s763_s16]] }
  0x37   :  { %s100_s20 = sshll.u32 %s90_s18, 4  ;;  %s705_s22 = smov [#allocation2 + $0x4]   ;;  %s101_s20 = int_to_ptr.hbm [resolvable:$true] %s100_s20 }
  0x38   :  { %s807_s7 = sshll.u32 %s705_s22, 4  ;;  %s508_s23 = sshra.s32 %s101_s20, 4  ;;  %s509_s23 = int_to_ptr.hbm [resolvable:$true] %s508_s23  ;;  %s149_s7 = int_to_ptr.vmem [resolvable:$true] %s807_s7 }
  0x39   :  { %s510_s24 = scalar_lea.hbm %s509_s23, 1  ;;  %p513_p5 = scmp.lt.s32.totalorder %s509_s23, %s885_s2 }
  0x3a   :  { %p511_p4 = scmp.ne.s32.totalorder %s509_s23, %s510_s24  ;;  %p514_p6 = scmp.lt.s32.totalorder %s775_s27, %s510_s24 }
  0x3c   :  { %p515_p7 = por %p514_p6, %p513_p5 }
  0x3e   :  { %p516_p8 = pnand %p515_p7, %p511_p4 }
  0x40   :  { %519 = shalt.err (!%p516_p8)  }
  0x41   :  { %105 = dma.hbm_to_vmem [thread:$0]  %s101_s20, 16, %s103_s9, [#allocation3 + $0x2] }
  0x42   :  { %s900_s10 = smov (!%p346_p3, %s110_s10), 31  ;;  %s363_s14 = sld [smem:[#allocation5 + $0x6]] }
  0x43   :  { %s113_s26 = scalar_lea.hbm %s885_s2, %s900_s10  ;;  %p132_p9 = scmp.gt.s32.totalorder %s802_s19, 0 }
  0x44   :  { %s123_s1 = sshll.u32 %s113_s26, 4  ;;  %p352_p10 = scmp.lt.s32.totalorder %s802_s19, 31  ;;  %s124_s1 = int_to_ptr.hbm [resolvable:$true] %s123_s1 }
  0x45   :  { %p155_p11 = scmp.gt.s32.totalorder %s805_s21, 0  ;;  %s532_s29 = sshra.s32 %s124_s1, 4  ;;  %s533_s29 = int_to_ptr.hbm [resolvable:$true] %s532_s29 }
  0x46   :  { %s534_s30 = scalar_lea.hbm %s533_s29, 1  ;;  %p537_p13 = scmp.lt.s32.totalorder %s533_s29, %s885_s2 }
  0x47   :  { %p535_p12 = scmp.ne.s32.totalorder %s533_s29, %s534_s30  ;;  %p538_p0 = scmp.lt.s32.totalorder %s775_s27, %s534_s30 }
  0x49   :  { %p539_p1 = por %p538_p0, %p537_p13 }
  0x4b   :  { %p540_p2 = pnand %p539_p1, %p535_p12 }
  0x4d   :  { %543 = shalt.err (!%p540_p2)  }
  0x4e   :  { %128 = dma.hbm_to_vmem [thread:$0]  %s124_s1, 16, %s126_s12, [#allocation3 + $0x3] }
  0x4f   :  { %s133_s9 = scalar_select %p132_p9, %s802_s19, 0 }
  0x50   :  { %s156_s15 = scalar_select %p155_p11, %s805_s21, 0 }
  0x51   :  { %s902_s9 = smov (!%p352_p10, %s133_s9), 31  ;;  %s836_s3 = sld [smem:[#allocation6 + %s363_s14]] }
  0x52   :  { %s136_s10 = scalar_lea.hbm %s885_s2, %s902_s9  ;;  %p358_p3 = scmp.lt.s32.totalorder %s805_s21, 31 }
  0x53   :  { %s146_s11 = sshll.u32 %s136_s10, 4  ;;  %s706_s17 = smov [#allocation2 + $0x5]   ;;  %s147_s11 = int_to_ptr.hbm [resolvable:$true] %s146_s11 }
  0x54   :  { %s842_s18 = sshll.u32 %s706_s17, 4  ;;  %s556_s20 = sshra.s32 %s147_s11, 4  ;;  %s557_s20 = int_to_ptr.hbm [resolvable:$true] %s556_s20  ;;  %s172_s18 = int_to_ptr.vmem [resolvable:$true] %s842_s18 }
  0x55   :  { %s558_s12 = scalar_lea.hbm %s557_s20, 1  ;;  %p561_p5 = scmp.lt.s32.totalorder %s557_s20, %s885_s2 }
  0x56   :  { %p559_p4 = scmp.ne.s32.totalorder %s557_s20, %s558_s12  ;;  %p562_p6 = scmp.lt.s32.totalorder %s775_s27, %s558_s12 }
  0x58   :  { %p563_p7 = por %p562_p6, %p561_p5 }
  0x5a   :  { %p564_p8 = pnand %p563_p7, %p559_p4 }
  0x5c   :  { %567 = shalt.err (!%p564_p8)  }
  0x5d   :  { %151 = dma.hbm_to_vmem [thread:$0]  %s147_s11, 16, %s149_s7, [#allocation3 + $0x4] }
  0x5e   :  { %s904_s15 = smov (!%p358_p3, %s156_s15), 31  ;;  %p178_p9 = scmp.gt.s32.totalorder %s836_s3, 0 }
  0x5f   :  { %s159_s13 = scalar_lea.hbm %s885_s2, %s904_s15  ;;  %s369_s25 = sld [smem:[#allocation5 + $0x7]] }
  0x60   :  { %s169_s14 = sshll.u32 %s159_s13, 4  ;;  %p364_p10 = scmp.lt.s32.totalorder %s836_s3, 31  ;;  %s170_s14 = int_to_ptr.hbm [resolvable:$true] %s169_s14 }
  0x61   :  { %s580_s16 = sshra.s32 %s170_s14, 4  ;;  %s581_s16 = int_to_ptr.hbm [resolvable:$true] %s580_s16 }
  0x62   :  { %s582_s0 = scalar_lea.hbm %s581_s16, 1  ;;  %p585_p12 = scmp.lt.s32.totalorder %s581_s16, %s885_s2 }
  0x63   :  { %p583_p11 = scmp.ne.s32.totalorder %s581_s16, %s582_s0  ;;  %p586_p13 = scmp.lt.s32.totalorder %s775_s27, %s582_s0 }
  0x65   :  { %p587_p0 = por %p586_p13, %p585_p12 }
  0x67   :  { %p588_p1 = pnand %p587_p0, %p583_p11 }
  0x69   :  { %591 = shalt.err (!%p588_p1)  }
  0x6a   :  { %174 = dma.hbm_to_vmem [thread:$0]  %s170_s14, 16, %s172_s18, [#allocation3 + $0x5] }
  0x6b   :  { %s179_s21 = scalar_select %p178_p9, %s836_s3, 0 }
  0x6c   :  { %s707_s7 = smov [#allocation2 + $0x6]   ;;  %s200_s30 = sld [smem:[#allocation6 + %s369_s25]] }
  0x6d   :  { %s194_s29 = sshll.u32 %s707_s7, 4  ;;  %s906_s21 = smov (!%p364_p10, %s179_s21), 31  ;;  %s195_s29 = int_to_ptr.vmem [resolvable:$true] %s194_s29 }
  0x6e   :  { %s182_s9 = scalar_lea.hbm %s885_s2, %s906_s21 }
  0x6f   :  { %s192_s15 = sshll.u32 %s182_s9, 4  ;;  %s193_s15 = int_to_ptr.hbm [resolvable:$true] %s192_s15 }
  0x70   :  { %s604_s8 = sshra.s32 %s193_s15, 4  ;;  %s605_s8 = int_to_ptr.hbm [resolvable:$true] %s604_s8 }
  0x71   :  { %s606_s28 = scalar_lea.hbm %s605_s8, 1  ;;  %p609_p3 = scmp.lt.s32.totalorder %s605_s8, %s885_s2 }
  0x72   :  { %p607_p2 = scmp.ne.s32.totalorder %s605_s8, %s606_s28  ;;  %p610_p4 = scmp.lt.s32.totalorder %s775_s27, %s606_s28 }
  0x74   :  { %p611_p5 = por %p610_p4, %p609_p3 }
  0x76   :  { %p612_p6 = pnand %p611_p5, %p607_p2 }
  0x78   :  { %615 = shalt.err (!%p612_p6)  }
  0x79   :  { %197 = dma.hbm_to_vmem [thread:$0]  %s193_s15, 16, %s195_s29, [#allocation3 + $0x6] }
  0x7a   :  { %p201_p7 = scmp.gt.s32.totalorder %s200_s30, 0  ;;  %p370_p8 = scmp.lt.s32.totalorder %s200_s30, 31 }
  0x7b   :  { %s708_s3 = smov [#allocation2 + $0x7]  }
  0x7c   :  { %s908_s30 = smov (!%p201_p7, %s200_s30), 0  ;;  %s217_s17 = sshll.u32 %s708_s3, 4  ;;  %s218_s17 = int_to_ptr.vmem [resolvable:$true] %s217_s17 }
  0x7d   :  { %s910_s30 = smov (!%p370_p8, %s908_s30), 31 }
  0x7e   :  { %s205_s12 = scalar_lea.hbm %s885_s2, %s910_s30 }
  0x7f   :  { %s215_s22 = sshll.u32 %s205_s12, 4  ;;  %s216_s22 = int_to_ptr.hbm [resolvable:$true] %s215_s22 }
  0x80   :  { %s628_s23 = sshra.s32 %s216_s22, 4  ;;  %s629_s23 = int_to_ptr.hbm [resolvable:$true] %s628_s23 }
  0x81   :  { %s630_s19 = scalar_lea.hbm %s629_s23, 1  ;;  %p633_p10 = scmp.lt.s32.totalorder %s629_s23, %s885_s2 }
  0x82   :  { %p631_p9 = scmp.ne.s32.totalorder %s629_s23, %s630_s19  ;;  %p634_p11 = scmp.lt.s32.totalorder %s775_s27, %s630_s19 }
  0x84   :  { %p635_p12 = por %p634_p11, %p633_p10 }
  0x86   :  { %p636_p13 = pnand %p635_p12, %p631_p9 }
  0x88   :  { %639 = shalt.err (!%p636_p13)  }
  0x89   :  { %220 = dma.hbm_to_vmem [thread:$0]  %s216_s22, 16, %s218_s17, [#allocation3 + $0x7] }
  0x8a   :  { %680 = dma.done.wait [#allocation3], 16 }
  0x8b   :  { %681 = vsyncadd [#allocation3], 4294967280 }
  0x8c   :  { %682 = dma.done.wait [#allocation3 + $0x1], 16 }
  0x8d   :  { %683 = vsyncadd [#allocation3 + $0x1], 4294967280 }
  0x8e   :  { %684 = dma.done.wait [#allocation3 + $0x2], 16 }
  0x8f   :  { %685 = vsyncadd [#allocation3 + $0x2], 4294967280 }
  0x90   :  { %686 = dma.done.wait [#allocation3 + $0x3], 16 }
  0x91   :  { %687 = vsyncadd [#allocation3 + $0x3], 4294967280 }
  0x92   :  { %688 = dma.done.wait [#allocation3 + $0x4], 16 }
  0x93   :  { %689 = vsyncadd [#allocation3 + $0x4], 4294967280 }
  0x94   :  { %690 = dma.done.wait [#allocation3 + $0x5], 16 }
  0x95   :  { %691 = vsyncadd [#allocation3 + $0x5], 4294967280 }
  0x96   :  { %692 = dma.done.wait [#allocation3 + $0x6], 16 }
  0x97   :  { %693 = vsyncadd [#allocation3 + $0x6], 4294967280 }
  0x98   :  { %694 = dma.done.wait [#allocation3 + $0x7], 16 }
  0x99   :  { %695 = vsyncadd [#allocation3 + $0x7], 4294967280  ;;  %vm239_vm0 = vcmask 261120   ;;  %v238_v0 = vld [vmem:[#allocation2] sm:$0xff]  ;;  %v241_v1 = vld [vmem:[#allocation7] sm:$0xff]  ;;  %s709_s2 = smov 32  }
  0x9a   :  { %240 = vst.msk [vmem:[#allocation10] sm:$0xff] %vm239_vm0, %v238_v0  ;;  %243 = vrot.lane.b32.xlu0 %v241_v1, %s709_s2  ;;  %s710_s27 = smov [#allocation10]   ;;  %s255_s0 = sshll.u32 %s887_s4, 4  ;;  %vm246_vm1 = vcmask 523520   ;;  %s256_s0 = int_to_ptr.hbm [resolvable:$true] %s255_s0 }
  0x9b   :  { %s253_s25 = sshll.u32 %s710_s27, 4  ;;  %s254_s25 = int_to_ptr.vmem [resolvable:$true] %s253_s25 }
 0x10c   :  { %v244_v2 = vpop.permute.xlu0 %243 }
 0x10d   :  { %247 = vst.msk [vmem:[#allocation10] sm:$0xff] %vm246_vm1, %v244_v2 }
 0x10e   :  { %258 = dma.vmem_to_hbm [thread:$0]  %s254_s25, 128, %s256_s0, [#allocation9]  }
 0x10f   :  { %696 = dma.done.wait [#allocation9], 128  }
 0x110   :  { %697 = vsyncadd [#allocation9], 4294967168 }
 0x111   :  { %263 = vsyncpa [#allocation8], 1 }
 0x112   :  { %264 = vsyncpa [#allocation9], 1 }
 0x113   :  { %265 = vsyncmov [#allocation3] }
 0x116   :  { %s266_s26 = vpop.sfrf %265 }
 0x117   :  { %p375_p0 = scmp.ne.s32.totalorder %s266_s26, 0 }
 0x119   :  { %270 = shalt.err (%p375_p0)  }
 0x11a   :  { %272 = vsyncmov [#allocation3 + $0x1] }
 0x11d   :  { %s273_s1 = vpop.sfrf %272 }
 0x11e   :  { %p376_p1 = scmp.ne.s32.totalorder %s273_s1, 0 }
 0x120   :  { %277 = shalt.err (%p376_p1)  }
 0x121   :  { %279 = vsyncmov [#allocation3 + $0x2] }
 0x124   :  { %s280_s4 = vpop.sfrf %279 }
 0x125   :  { %p377_p2 = scmp.ne.s32.totalorder %s280_s4, 0 }
 0x127   :  { %284 = shalt.err (%p377_p2)  }
 0x128   :  { %286 = vsyncmov [#allocation3 + $0x3] }
 0x12b   :  { %s287_s21 = vpop.sfrf %286 }
 0x12c   :  { %p378_p3 = scmp.ne.s32.totalorder %s287_s21, 0 }
 0x12e   :  { %291 = shalt.err (%p378_p3)  }
 0x12f   :  { %293 = vsyncmov [#allocation3 + $0x4] }
 0x132   :  { %s294_s7 = vpop.sfrf %293 }
 0x133   :  { %p379_p4 = scmp.ne.s32.totalorder %s294_s7, 0 }
 0x135   :  { %298 = shalt.err (%p379_p4)  }
 0x136   :  { %300 = vsyncmov [#allocation3 + $0x5] }
 0x139   :  { %s301_s29 = vpop.sfrf %300 }
 0x13a   :  { %p380_p5 = scmp.ne.s32.totalorder %s301_s29, 0 }
 0x13c   :  { %305 = shalt.err (%p380_p5)  }
 0x13d   :  { %307 = vsyncmov [#allocation3 + $0x6] }
 0x140   :  { %s308_s30 = vpop.sfrf %307 }
 0x141   :  { %p381_p6 = scmp.ne.s32.totalorder %s308_s30, 0 }
 0x143   :  { %312 = shalt.err (%p381_p6)  }
 0x144   :  { %314 = vsyncmov [#allocation3 + $0x7] }
 0x147   :  { %s315_s5 = vpop.sfrf %314 }
 0x148   :  { %p382_p7 = scmp.ne.s32.totalorder %s315_s5, 0 }
 0x14a   :  { %319 = shalt.err (%p382_p7)  }

</bundles_post_ra>
